<compile_context>
chip_gen: v5e
topology: v5e:2x2
jax: 0.10.0
libtpu: 0.0.40
codegen_flags: <defaults>
</compile_context>

<pallas_src>
import functools

import jax
import jax.numpy as jnp
from jax.experimental import pallas as pl
from jax.experimental.pallas import tpu as pltpu


def _round_up(v, m):
    return (v + m - 1) // m * m


def _vmem_bytes(tm, tn, tk, x_item, w_item, out_item, split_k):
    est = 2 * tm * tk * x_item          # x tile, double buffered
    est += 2 * tk * tn * w_item         # w tile, double buffered
    est += 2 * tm * tn * out_item       # out tile, double buffered
    est += 2 * tn * 4                   # bias tile (f32), double buffered
    if split_k:
        est += tm * tn * 4              # f32 accumulator scratch
    return est


def _device_kind():
    try:
        return jax.devices()[0].device_kind.lower()
    except Exception:
        return ""


# ----------------------------------------------------------------------------
# Kernels
# ----------------------------------------------------------------------------
def _td_linear_kernel_single_k(x_ref, w_ref, b_ref, o_ref):
    # x_ref: (tm, F)  w_ref: (F, tn)  b_ref: (1, tn) f32  o_ref: (tm, tn)
    # Single K block: one dot per output tile, bias added in f32, no scratch.
    acc = jnp.dot(x_ref[...].astype(w_ref.dtype), w_ref[...],
                  preferred_element_type=jnp.float32)
    o_ref[...] = (acc + b_ref[...]).astype(o_ref.dtype)


def _td_linear_kernel_split_k(x_ref, w_ref, b_ref, o_ref, acc_ref, *,
                              tk, f_total, mask_k):
    # x_ref: (tm, tk)  w_ref: (tk, tn)  b_ref: (1, tn) f32
    # o_ref: (tm, tn)  acc_ref: (tm, tn) f32 scratch
    k = pl.program_id(2)

    @pl.when(k == 0)
    def _():
        # Fold the bias into the accumulator init: no epilogue add needed.
        acc_ref[...] = jnp.broadcast_to(b_ref[...], acc_ref.shape)

    x = x_ref[...]
    w_blk = w_ref[...]
    if mask_k:
        # The last K block runs past F (x/w are NOT padded in HBM).
        # Zero BOTH operands' out-of-range elements: garbage * 0 could be NaN,
        # so a one-sided mask is not enough.
        rem = f_total - k * tk
        x_col = jax.lax.broadcasted_iota(jnp.int32, x.shape, 1)
        w_row = jax.lax.broadcasted_iota(jnp.int32, w_blk.shape, 0)
        x = jnp.where(x_col < rem, x, jnp.zeros_like(x))
        w_blk = jnp.where(w_row < rem, w_blk, jnp.zeros_like(w_blk))

    acc_ref[...] += jnp.dot(x.astype(w_blk.dtype), w_blk,
                            preferred_element_type=jnp.float32)

    @pl.when(k == pl.num_programs(2) - 1)
    def _():
        o_ref[...] = acc_ref[...].astype(o_ref.dtype)


# ----------------------------------------------------------------------------
# Wrapper
# ----------------------------------------------------------------------------
def time_distributed_linear(x, w, b, *, tile_m=512, tile_n=512, tile_k=1024,
                            compute_dtype=None):
    """TimeDistributed(Linear) forward.

    x: (B, T, F)
    w: (F, H)   (transposed PyTorch Linear weight)
    b: (H,)
    returns: (B, T, H) in x.dtype
    """
    B, T, F = x.shape
    H = w.shape[1]
    BT = B * T
    out_dtype = x.dtype
    if compute_dtype is None:
        compute_dtype = w.dtype  # pass compute_dtype=jnp.bfloat16 on v6e/v7x

    kind = _device_kind()
    is_v7 = ("v7" in kind) or ("tpu7" in kind)
    # v7x: 64 MiB VMEM per TensorCore; v5e/v6e: 128 MiB.
    vmem_budget = (40 if is_v7 else 80) * 1024 * 1024
    vmem_cap = (56 if is_v7 else 100) * 1024 * 1024

    x_item = jnp.dtype(x.dtype).itemsize
    w_item = jnp.dtype(compute_dtype).itemsize
    out_item = jnp.dtype(out_dtype).itemsize

    # ---- tile selection: biggest that fits, clamped to the problem ---------
    # Rows (sublane dim): full dim for small problems, else a multiple of 8.
    tm = BT if BT <= tile_m else max(8, (tile_m // 8) * 8)
    # Lane dims: full dim for small problems, else multiples of 128.
    tn = H if H <= tile_n else max(128, (tile_n // 128) * 128)

    # Collapse K whenever the whole reduction fits the VMEM budget.
    split_k = not (
        F <= tile_k
        and _vmem_bytes(tm, tn, F, x_item, w_item, out_item, False)
        <= vmem_budget)
    if split_k:
        tk = min(max(128, (tile_k // 128) * 128), _round_up(F, 128))
        while (_vmem_bytes(tm, tn, tk, x_item, w_item, out_item, True)
               > vmem_budget and tk > 128):
            tk = max(128, (tk // 2 // 128) * 128)
    else:
        tk = F

    # Last-resort: clamp tiles (never the vmem limit) so we never silently
    # under-provision vmem_limit_bytes.
    while _vmem_bytes(tm, tn, tk, x_item, w_item, out_item, split_k) > vmem_budget:
        if tm > 8 and tm >= tn:
            tm = max(8, (tm // 2 // 8) * 8)
        elif tn > 128:
            tn = max(128, (tn // 2 // 128) * 128)
        else:
            break

    gm = pl.cdiv(BT, tm)
    gn = pl.cdiv(H, tn)

    vmem_est = _vmem_bytes(tm, tn, tk, x_item, w_item, out_item, split_k)
    vmem_limit = int(min(max(int(vmem_est * 1.5) + (4 << 20), 32 << 20),
                         vmem_cap))

    # ---- glue (cheap): reshape x (free), cast weights once, f32 bias row ----
    x2d = x.reshape(BT, F)                 # no pad, no cast, no HBM pass
    w_c = w.astype(compute_dtype)          # weights only; hoist/jit to amortize
    b2d = b.reshape(1, H).astype(jnp.float32)

    if not split_k:
        # Single-K kernel. Put the larger parallel axis first when M doesn't
        # tile so v7x's two TensorCores both get work (x traffic unchanged:
        # with gm == 1 the x tile index is constant either way).
        swap_ij = (gm == 1 and gn > 1)
        if swap_ij:
            grid = (gn, gm)
            x_map = lambda j, i: (i, 0)
            w_map = lambda j, i: (0, j)
            b_map = lambda j, i: (0, j)
            o_map = lambda j, i: (i, j)
        else:
            grid = (gm, gn)
            x_map = lambda i, j: (i, 0)
            w_map = lambda i, j: (0, j)
            b_map = lambda i, j: (0, j)
            o_map = lambda i, j: (i, j)

        out2d = pl.pallas_call(
            _td_linear_kernel_single_k,
            out_shape=jax.ShapeDtypeStruct((BT, H), out_dtype),
            grid_spec=pltpu.PrefetchScalarGridSpec(
                num_scalar_prefetch=0,
                grid=grid,
                in_specs=[
                    pl.BlockSpec((tm, tk), x_map),
                    pl.BlockSpec((tk, tn), w_map),
                    pl.BlockSpec((1, tn), b_map),
                ],
                out_specs=pl.BlockSpec((tm, tn), o_map),
            ),
            compiler_params=pltpu.CompilerParams(
                dimension_semantics=("parallel", "parallel"),
                vmem_limit_bytes=vmem_limit,
            ),
        )(x2d, w_c, b2d)
    else:
        gk = pl.cdiv(F, tk)
        kern = functools.partial(_td_linear_kernel_split_k,
                                 tk=tk, f_total=F, mask_k=(F % tk != 0))
        out2d = pl.pallas_call(
            kern,
            out_shape=jax.ShapeDtypeStruct((BT, H), out_dtype),
            grid_spec=pltpu.PrefetchScalarGridSpec(
                num_scalar_prefetch=0,
                grid=(gm, gn, gk),
                in_specs=[
                    pl.BlockSpec((tm, tk), lambda i, j, k: (i, k)),
                    pl.BlockSpec((tk, tn), lambda i, j, k: (k, j)),
                    pl.BlockSpec((1, tn), lambda i, j, k: (0, j)),
                ],
                out_specs=pl.BlockSpec((tm, tn), lambda i, j, k: (i, j)),
                scratch_shapes=[pltpu.VMEM((tm, tn), jnp.float32)],
            ),
            compiler_params=pltpu.CompilerParams(
                dimension_semantics=("parallel", "parallel", "arbitrary"),
                vmem_limit_bytes=vmem_limit,
            ),
        )(x2d, w_c, b2d)

    # The PyTorch .view(batch, time, -1)
    return out2d.reshape(B, T, H)


if __name__ == "__main__":
    # Small shapes implied by the forward: (batch, time, features).
    B, T, F, H = 2, 8, 32, 32

    key = jax.random.PRNGKey(0)
    kx, kw, kb = jax.random.split(key, 3)

    x = jax.random.normal(kx, (B, T, F), dtype=jnp.float32)
    # PyTorch Linear weight would be (H, F); we store the transpose (F, H).
    w = jax.random.normal(kw, (F, H), dtype=jnp.float32) * 0.1
    b = jax.random.normal(kb, (H,), dtype=jnp.float32) * 0.1

    ref = (x.reshape(B * T, F) @ w + b).reshape(B, T, H)

    # f32 path (collapsed K, single dot per tile). Tolerance accounts for the
    # TPU's default (reduced-precision) f32 matmul passes on either side.
    out = time_distributed_linear(x, w, b)
    jax.block_until_ready(out)
    assert out.shape == (B, T, H)
    assert jnp.allclose(out, ref, atol=2e-2, rtol=2e-2)

    # bf16-compute path (MXU-native rate on v6e/v7x); x cast in-kernel,
    # f32 accumulation + f32 bias add.
    out_bf16 = time_distributed_linear(x, w, b, compute_dtype=jnp.bfloat16)
    jax.block_until_ready(out_bf16)
    assert jnp.allclose(out_bf16, ref, atol=1e-1, rtol=1e-1)

    # Oddly-sized problem with forced small tiles: exercises partial M and N
    # blocks (no x padding) and the split-K path with the in-kernel K mask.
    B2, T2, F2, H2 = 3, 37, 200, 160
    x2 = jax.random.normal(kx, (B2, T2, F2), dtype=jnp.float32)
    w2 = jax.random.normal(kw, (F2, H2), dtype=jnp.float32) * 0.05
    b2 = jax.random.normal(kb, (H2,), dtype=jnp.float32) * 0.05
    ref2 = (x2.reshape(B2 * T2, F2) @ w2 + b2).reshape(B2, T2, H2)
    out2 = time_distributed_linear(x2, w2, b2,
                                   tile_m=64, tile_n=128, tile_k=128)
    jax.block_until_ready(out2)
    assert out2.shape == (B2, T2, H2)
    assert jnp.allclose(out2, ref2, atol=2e-2, rtol=2e-2)

    # Small-BT / wide-H case: exercises the swapped (N-leading) parallel grid
    # used to keep both v7x TensorCores busy when M doesn't tile.
    B3, T3, F3, H3 = 1, 8, 64, 512
    x3 = jax.random.normal(kx, (B3, T3, F3), dtype=jnp.float32)
    w3 = jax.random.normal(kw, (F3, H3), dtype=jnp.float32) * 0.05
    b3 = jax.random.normal(kb, (H3,), dtype=jnp.float32) * 0.05
    ref3 = (x3.reshape(B3 * T3, F3) @ w3 + b3).reshape(B3, T3, H3)
    out3 = time_distributed_linear(x3, w3, b3, tile_n=128)
    jax.block_until_ready(out3)
    assert out3.shape == (B3, T3, H3)
    assert jnp.allclose(out3, ref3, atol=2e-2, rtol=2e-2)

    print("KERNEL_OK")
</pallas_src>

<mosaic_0001>
module attributes {stable_mosaic.version = 11 : i64} {
  func.func @_td_linear_kernel_single_k(%arg0: i32, %arg1: i32, %arg2: memref<16x32xf32, #tpu.memory_space<vmem>>, %arg3: memref<32x32xf32, #tpu.memory_space<vmem>>, %arg4: memref<1x32xf32, #tpu.memory_space<vmem>>, %arg5: memref<16x32xf32, #tpu.memory_space<vmem>>) attributes {dimension_semantics = [#tpu.dimension_semantics<parallel>, #tpu.dimension_semantics<parallel>], iteration_bounds = array<i64: 1, 1>, scalar_prefetch = 0 : i64, scratch_operands = 0 : i64, tpu.core_type = #tpu.core_type<tc>, window_params = [{transform_indices = @transform_0, window_bounds = array<i64: 16, 32>}, {transform_indices = @transform_1, window_bounds = array<i64: 32, 32>}, {transform_indices = @transform_2, window_bounds = array<i64: 1, 32>}, {transform_indices = @transform_3, window_bounds = array<i64: 16, 32>}]} {
    %c0 = arith.constant 0 : index
    %c0_0 = arith.constant 0 : index
    %0 = vector.load %arg2[%c0, %c0_0] : memref<16x32xf32, #tpu.memory_space<vmem>>, vector<16x32xf32>
    %c0_1 = arith.constant 0 : index
    %c0_2 = arith.constant 0 : index
    %1 = vector.load %arg3[%c0_1, %c0_2] : memref<32x32xf32, #tpu.memory_space<vmem>>, vector<32x32xf32>
    %cst = arith.constant dense<0.000000e+00> : vector<16x32xf32>
    %2 = tpu.matmul %0, %1, %cst {dimension_numbers = #tpu.dot_dimension_numbers<[1], [0], [0], [1], [0, 0, 1, 1], [], []>} : vector<16x32xf32>, vector<32x32xf32>, vector<16x32xf32> -> vector<16x32xf32>
    %c0_3 = arith.constant 0 : index
    %c0_4 = arith.constant 0 : index
    %3 = vector.load %arg4[%c0_3, %c0_4] : memref<1x32xf32, #tpu.memory_space<vmem>>, vector<1x32xf32>
    %4 = vector.broadcast %3 : vector<1x32xf32> to vector<16x32xf32>
    %5 = arith.addf %2, %4 : vector<16x32xf32>
    %c0_5 = arith.constant 0 : index
    %c0_6 = arith.constant 0 : index
    %6 = vector.load %arg5[%c0_5, %c0_6] : memref<16x32xf32, #tpu.memory_space<vmem>>, vector<16x32xf32>
    tpu.vector_store %arg5[%c0_5, %c0_6], %5 {strides = array<i32>} : memref<16x32xf32, #tpu.memory_space<vmem>>, vector<16x32xf32>,
    return
  }
  func.func @transform_0(%arg0: i32, %arg1: i32) -> (i32, i32) {
    %c0_i32 = arith.constant 0 : i32
    %c0_i32_0 = arith.constant 0 : i32
    return %arg0, %c0_i32 : i32, i32
  }
  func.func @transform_1(%arg0: i32, %arg1: i32) -> (i32, i32) {
    %c0_i32 = arith.constant 0 : i32
    %c0_i32_0 = arith.constant 0 : i32
    return %c0_i32, %arg1 : i32, i32
  }
  func.func @transform_2(%arg0: i32, %arg1: i32) -> (i32, i32) {
    %c0_i32 = arith.constant 0 : i32
    %c0_i32_0 = arith.constant 0 : i32
    return %c0_i32, %arg1 : i32, i32
  }
  func.func @transform_3(%arg0: i32, %arg1: i32) -> (i32, i32) {
    %c0_i32 = arith.constant 0 : i32
    return %arg0, %arg1 : i32, i32
  }
}

</mosaic_0001>

<bundles_post_ra>
// kernel: tpu_custom_call.1
= control target key start
LH: loop header
LB: loop body
LE: loop exit
PB: predicated region body
PF: predicated region fallthrough
CT: control target
= control target key end

     0   :  { %8 = vsyncpa [#allocation3], 0  ;;  %s249_s0 = inlined_call_operand.hbm [shape: f32[16,32], index: 0, kind: input, shape index: {}]   ;;  %s250_s1 = inlined_call_operand.hbm [shape: f32[32,32], index: 1, kind: input, shape index: {}]   ;;  %s251_s2 = inlined_call_operand.vmem [shape: f32[1,32], index: 2, kind: input, shape index: {}]   ;;  %s252_s3 = inlined_call_operand.hbm [shape: f32[16,32], index: 3, kind: output, shape index: {}]  }
   0x1   :  { %9 = vsyncpa [#allocation6], 0 }
   0x2   :  { %10 = vsyncpa [#allocation4], 0  ;;  %s15_s14 = sshll.u32 %s249_s0, 4  ;;  %s199_s15 = smov [#allocation2]   ;;  %s16_s14 = int_to_ptr.hbm [resolvable:$true] %s15_s14 }
   0x3   :  { %s17_s16 = sshll.u32 %s199_s15, 4  ;;  %s28_s19 = sshll.u32 %s250_s1, 4  ;;  %s18_s16 = int_to_ptr.vmem [resolvable:$true] %s17_s16  ;;  %s29_s19 = int_to_ptr.hbm [resolvable:$true] %s28_s19 }
   0x4   :  { %s200_s20 = smov 128   ;;  %s201_s21 = smov 8  }
   0x5   :  { %23 = dma.hbm_to_vmem [thread:$0]  %s16_s14, 256, %s18_s16, [#allocation3], %s200_s20, %s200_s20, %s201_s21  }
   0x6   :  { %s202_s22 = smov [#allocation5]  }
   0x7   :  { %s30_s23 = sshll.u32 %s202_s22, 4  ;;  %s31_s23 = int_to_ptr.vmem [resolvable:$true] %s30_s23 }
   0x8   :  { %36 = dma.hbm_to_vmem [thread:$0]  %s29_s19, 512, %s31_s23, [#allocation6], %s200_s20, %s200_s20, %s201_s21  }
   0x9   :  { %193 = dma.done.wait [#allocation3], 256  }
   0xa   :  { %194 = vsyncadd [#allocation3], 4294967040 }
   0xb   :  { %195 = dma.done.wait [#allocation6], 512  }
   0xc   :  { %196 = vsyncadd [#allocation6], 4294966784  ;;  %v52_v0 = vld [vmem:[#allocation5 + $0x18] sm:$0xff]  ;;  %v51_v1 = vld [vmem:[#allocation5 + $0x10] sm:$0xff]  ;;  %vm57_vm0 = vcmask 261120   ;;  %s203_s24 = smov [#allocation7]  }
   0xd   :  { %76 = vmatpush.msra.mxu0 %v52_v0  ;;  %111 = vmatpush.msra.mxu1 %v52_v0  ;;  %v50_v2 = vld [vmem:[#allocation5 + $0x8] sm:$0xff]  ;;  %v49_v3 = vld [vmem:[#allocation5] sm:$0xff]  ;;  %v47_v4 = vld [vmem:[#allocation2] sm:$0xff]  ;;  %s93_s25 = sshll.u32 %s203_s24, 4  ;;  %s95_s28 = sshll.u32 %s252_s3, 4  ;;  %s94_s25 = int_to_ptr.vmem [resolvable:$true] %s93_s25  ;;  %s96_s28 = int_to_ptr.hbm [resolvable:$true] %s95_s28 }
   0xe   :  { %v48_v5 = vld [vmem:[#allocation2 + $0x8] sm:$0xff]  ;;  %v120_v6 = vld [vmem:[%s251_s2] ss:$0 sm:$0xff] }
   0xf   :  { %77 = vmatpush.msra.mxu0 %v51_v1  ;;  %112 = vmatpush.msra.mxu1 %v51_v1 }
  0x11   :  { %78 = vmatpush.msra.mxu0 %v50_v2  ;;  %113 = vmatpush.msra.mxu1 %v50_v2 }
  0x13   :  { %79 = vmatpush.msra.mxu0 %v49_v3  ;;  %114 = vmatpush.msra.mxu1 %v49_v3 }
  0x14   :  { %109 = vmatmul.msk.f32.vlgmr.msra.gmra.mxu0 %vm57_vm0, %v47_v4  ;;  %110 = vmatmul.msk.f32.vlgmr.msra.gmra.mxu1 %vm57_vm0, %v48_v5 }
  0x91   :  { %v81_v7 = vpop.f32.mrf.mxu0  ;;  %v84_v8 = vpop.f32.mrf.mxu1 }
  0x92   :  { %v82_v9 = vadd.f32 %v120_v6, %v81_v7  ;;  %v85_v10 = vadd.f32 %v120_v6, %v84_v8 }
  0x94   :  { %87 = vst.msk [vmem:[#allocation7] sm:$0xff] %vm57_vm0, %v82_v9 }
  0x95   :  { %88 = vst.msk [vmem:[#allocation7 + $0x8] sm:$0xff] %vm57_vm0, %v85_v10 }
  0x96   :  { %101 = dma.vmem_to_hbm [thread:$0]  %s94_s25, 256, %s96_s28, [#allocation4], %s200_s20, %s200_s20, %s201_s21  }
  0x97   :  { %197 = dma.done.wait [#allocation4], 256  }
  0x98   :  { %198 = vsyncadd [#allocation4], 4294967040 }
  0x99   :  { %106 = vsyncpa [#allocation3], 1 }
  0x9a   :  { %107 = vsyncpa [#allocation6], 1 }
  0x9b   :  { %108 = vsyncpa [#allocation4], 1 }

</bundles_post_ra>
